<compile_context>
chip_gen: v7x
topology: tpu7x:2x2x1
jax: 0.10.0
libtpu: 0.0.40
codegen_flags: <defaults>
</compile_context>

<pallas_src>
import functools

import jax
import jax.numpy as jnp
from jax.experimental import pallas as pl
from jax.experimental.pallas import tpu as pltpu

_LANE = 128
_SUBLANE = 8


def _round_up(n, m):
    return (n + m - 1) // m * m


def _cdiv(a, b):
    return (a + b - 1) // b


def _vmem_budget_bytes():
    """Usable VMEM budget: ~85% of physical capacity (leaves Mosaic scratch headroom).

    Falls back to a 64 MiB capacity assumption (safe on v7x) if the query is unavailable.
    """
    try:
        cap = int(pltpu.get_tpu_info().vmem_capacity_bytes)
    except Exception:
        cap = 64 << 20
    return max(int(cap * 0.85), 16 << 20)


def _pad2d(a, rows, cols, dtype):
    a = jnp.asarray(a, dtype)
    if a.shape == (rows, cols):
        return a  # already aligned: no pad copy
    out = jnp.zeros((rows, cols), dtype)
    return out.at[: a.shape[0], : a.shape[1]].set(a)


def _mlp_kernel(x_ref, w1_ref, b1_ref, w2_ref, b2_ref, o_ref, acc_ref):
    """One (batch-tile, hidden-tile) grid step of Linear -> ReLU -> Linear."""
    h_idx = pl.program_id(1)

    @pl.when(h_idx == 0)
    def _():
        acc_ref[...] = jnp.zeros_like(acc_ref)

    # fc1 slice: (TB, Ip) @ (Ip, TH) -> f32 accumulate; bias + ReLU in one f32 VPU pass.
    # (ReLU is elementwise over the hidden dim, so splitting H across grid steps is exact.)
    h = jnp.dot(x_ref[...], w1_ref[...], preferred_element_type=jnp.float32)
    h = jnp.maximum(h + b1_ref[...], 0.0)
    # Single downcast before the second matmul (no-op when weights are f32).
    h = h.astype(w2_ref.dtype)
    # fc2 partial: (TB, TH) @ (TH, Cp) accumulated in f32 across hidden tiles.
    acc_ref[...] += jnp.dot(h, w2_ref[...], preferred_element_type=jnp.float32)

    @pl.when(h_idx == pl.num_programs(1) - 1)
    def _():
        o_ref[...] = (acc_ref[...] + b2_ref[...]).astype(o_ref.dtype)


@functools.partial(
    jax.jit,
    static_argnames=("B", "C", "TB", "TH", "out_dtype", "vmem_limit"),
)
def _forward_padded(xp, w1p, b1p, w2p, b2p, *, B, C, TB, TH, out_dtype, vmem_limit):
    Bp, Ip = xp.shape
    Hp = w1p.shape[1]
    Cp = w2p.shape[1]
    nb = Bp // TB
    nh = Hp // TH
    odt = jnp.dtype(out_dtype)

    cost = pl.CostEstimate(
        flops=2 * Bp * (Ip * Hp + Hp * Cp),
        transcendentals=0,
        bytes_accessed=(
            xp.size * xp.dtype.itemsize
            + w1p.size * w1p.dtype.itemsize
            + b1p.size * b1p.dtype.itemsize
            + w2p.size * w2p.dtype.itemsize
            + b2p.size * b2p.dtype.itemsize
            + Bp * Cp * odt.itemsize
        ),
    )

    out_p = pl.pallas_call(
        _mlp_kernel,
        out_shape=jax.ShapeDtypeStruct((Bp, Cp), odt),
        grid_spec=pltpu.PrefetchScalarGridSpec(
            num_scalar_prefetch=0,
            grid=(nb, nh),
            in_specs=[
                pl.BlockSpec((TB, Ip), lambda i, h: (i, 0)),   # streamed activations
                pl.BlockSpec((Ip, TH), lambda i, h: (0, h)),   # fc1 weight (resident if nh==1)
                pl.BlockSpec((1, TH), lambda i, h: (0, h)),    # fc1 bias (f32)
                pl.BlockSpec((TH, Cp), lambda i, h: (h, 0)),   # fc2 weight
                pl.BlockSpec((1, Cp), lambda i, h: (0, 0)),    # fc2 bias (f32)
            ],
            out_specs=pl.BlockSpec((TB, Cp), lambda i, h: (i, 0)),
            scratch_shapes=[pltpu.VMEM((TB, Cp), jnp.float32)],
        ),
        compiler_params=pltpu.CompilerParams(
            dimension_semantics=("parallel", "arbitrary"),
            vmem_limit_bytes=vmem_limit,
        ),
        cost_estimate=cost,
    )(xp, w1p, b1p, w2p, b2p)

    return out_p[:B, :C]


def prepare_params(w1, b1, w2, b2, *, compute_dtype=jnp.float32):
    """Pad weights/biases to lane-dense shapes once (outside the per-call path).

    Matmul operands (w1, w2) are stored in `compute_dtype` (use bf16 for large shapes:
    f32 accumulation is kept in-kernel); biases stay f32 for the accumulator-side add.
    Zero padding is semantically neutral (zero weight rows/cols, zero biases).
    """
    I, H = w1.shape
    C = w2.shape[1]
    Ip = _round_up(I, _LANE)
    Hp = _round_up(H, _LANE)
    Cp = _round_up(C, _LANE)
    cdt = jnp.dtype(compute_dtype)
    return dict(
        w1p=_pad2d(w1, Ip, Hp, cdt),
        b1p=_pad2d(jnp.reshape(b1, (1, H)), 1, Hp, jnp.float32),
        w2p=_pad2d(w2, Hp, Cp, cdt),
        b2p=_pad2d(jnp.reshape(b2, (1, C)), 1, Cp, jnp.float32),
        I=I, H=H, C=C, Ip=Ip, Hp=Hp, Cp=Cp,
        compute_dtype=cdt,
    )


def architecture1_forward(x, params, *, tile_b=512, vmem_budget=None):
    """x: (B, input_size) -> (B, num_classes), using params from prepare_params."""
    B, I = x.shape
    assert I == params["I"], (I, params["I"])
    Ip, Hp, Cp = params["Ip"], params["Hp"], params["Cp"]
    cdt = params["compute_dtype"]
    out_dtype = x.dtype

    budget = _vmem_budget_bytes() if vmem_budget is None else int(vmem_budget)

    # Batch tile: split B as evenly as possible, >= 2 grid steps when B allows (keeps both
    # v7x TensorCores busy via the "parallel" axis), multiples of 8 sublanes, <= tile_b rows.
    n_b = max(_cdiv(B, tile_b), 2 if B >= 2 * _SUBLANE else 1)
    TB = _round_up(_cdiv(B, n_b), _SUBLANE)
    Bp = _round_up(B, TB)

    cb = cdt.itemsize
    ob = jnp.dtype(out_dtype).itemsize

    def footprint(tb, th):
        # Double-buffered tiles (per-array dtypes) + f32 accumulator scratch.
        return (
            2 * tb * Ip * cb          # x tiles
            + 2 * Ip * th * cb        # w1 tiles
            + 2 * th * Cp * cb        # w2 tiles
            + 2 * th * 4              # b1 (f32)
            + 2 * Cp * 4              # b2 (f32)
            + 2 * tb * Cp * ob        # output tiles
            + tb * Cp * 4             # f32 accumulator
        )

    # Hidden tile: largest 128-multiple divisor of Hp that fits the budget (TH == Hp keeps
    # both weights fully VMEM-resident; smaller TH streams weight slices with f32 accumulate).
    th_candidates = [d for d in range(_LANE, Hp + 1, _LANE) if Hp % d == 0]
    TH = th_candidates[0]
    for d in th_candidates:
        if footprint(TB, d) <= budget:
            TH = d  # ascending -> ends at the largest fitting divisor
    # If even the smallest hidden tile doesn't fit, shrink the batch tile.
    while footprint(TB, TH) > budget and TB > _SUBLANE:
        TB = max(_SUBLANE, _round_up(TB // 2, _SUBLANE))
        Bp = _round_up(B, TB)
    # TODO(synk): if Ip or Cp alone exceed VMEM, a contraction/output split would be needed too.

    vmem_limit = int(min(max(2 * footprint(TB, TH), 4 << 20), budget))

    # Pad/cast activations only when needed (skip the copy entirely for aligned inputs).
    if (B, I) == (Bp, Ip) and x.dtype == cdt:
        xp = x
    else:
        xp = jnp.zeros((Bp, Ip), cdt).at[:B, :I].set(x.astype(cdt))

    return _forward_padded(
        xp, params["w1p"], params["b1p"], params["w2p"], params["b2p"],
        B=B, C=params["C"], TB=TB, TH=TH,
        out_dtype=str(jnp.dtype(out_dtype)), vmem_limit=vmem_limit,
    )


if __name__ == "__main__":
    # Small shapes implied by the module: input_size=32, hidden_size=64, num_classes=16, batch=8
    B, I, H, C = 8, 32, 64, 16

    key = jax.random.PRNGKey(0)
    kx, k1, k2, k3, k4 = jax.random.split(key, 5)

    x = jax.random.normal(kx, (B, I), dtype=jnp.float32)
    lim1 = 1.0 / jnp.sqrt(I)
    lim2 = 1.0 / jnp.sqrt(H)
    # Deterministic parameter init (uniform, roughly matching nn.Linear scale);
    # weights stored as (in_features, out_features) = transpose of nn.Linear.weight.
    w1 = jax.random.uniform(k1, (I, H), minval=-lim1, maxval=lim1, dtype=jnp.float32)
    b1 = jax.random.uniform(k2, (H,), minval=-lim1, maxval=lim1, dtype=jnp.float32)
    w2 = jax.random.uniform(k3, (H, C), minval=-lim2, maxval=lim2, dtype=jnp.float32)
    b2 = jax.random.uniform(k4, (C,), minval=-lim2, maxval=lim2, dtype=jnp.float32)

    # Pure-JAX reference.
    ref = jnp.maximum(x @ w1 + b1, 0.0) @ w2 + b2

    # f32 operands: exact PyTorch-equivalent semantics.
    params_f32 = prepare_params(w1, b1, w2, b2, compute_dtype=jnp.float32)
    out = architecture1_forward(x, params_f32)
    jax.block_until_ready(out)
    assert out.shape == (B, C)
    assert jnp.allclose(out, ref, atol=1e-4, rtol=1e-4), float(jnp.max(jnp.abs(out - ref)))

    # bf16 operands / f32 accumulation: the recommended large-shape configuration.
    params_bf16 = prepare_params(w1, b1, w2, b2, compute_dtype=jnp.bfloat16)
    out_bf16 = architecture1_forward(x, params_bf16)
    jax.block_until_ready(out_bf16)
    assert out_bf16.shape == (B, C)
    assert jnp.allclose(out_bf16, ref, atol=5e-2, rtol=5e-2), float(jnp.max(jnp.abs(out_bf16 - ref)))

    print("KERNEL_OK")
</pallas_src>

<mosaic_0001>
module attributes {stable_mosaic.version = 11 : i64} {
  func.func @_mlp_kernel(%arg0: i32, %arg1: i32, %arg2: memref<8x128xf32, #tpu.memory_space<vmem>>, %arg3: memref<128x128xf32, #tpu.memory_space<vmem>>, %arg4: memref<1x128xf32, #tpu.memory_space<vmem>>, %arg5: memref<128x128xf32, #tpu.memory_space<vmem>>, %arg6: memref<1x128xf32, #tpu.memory_space<vmem>>, %arg7: memref<8x128xf32, #tpu.memory_space<vmem>>, %arg8: memref<8x128xf32, #tpu.memory_space<vmem>>) attributes {dimension_semantics = [#tpu.dimension_semantics<parallel>, #tpu.dimension_semantics<arbitrary>], iteration_bounds = array<i64: 1, 1>, scalar_prefetch = 0 : i64, scratch_operands = 1 : i64, tpu.core_type = #tpu.core_type<tc>, window_params = [{transform_indices = @transform_0, window_bounds = array<i64: 8, 128>}, {transform_indices = @transform_1, window_bounds = array<i64: 128, 128>}, {transform_indices = @transform_2, window_bounds = array<i64: 1, 128>}, {transform_indices = @transform_3, window_bounds = array<i64: 128, 128>}, {pipeline_mode = #tpu.pipeline_mode<synchronous>, transform_indices = @transform_4, window_bounds = array<i64: 1, 128>}, {transform_indices = @transform_5, window_bounds = array<i64: 8, 128>}]} {
    %c0_i32 = arith.constant 0 : i32
    %0 = arith.cmpi eq, %arg1, %c0_i32 : i32
    %1 = arith.extui %0 : i1 to i32
    %c0_i32_0 = arith.constant 0 : i32
    %2 = arith.cmpi ne, %1, %c0_i32_0 : i32
    scf.if %2 {
      %cst_16 = arith.constant 0.000000e+00 : f32
      %19 = vector.broadcast %cst_16 : f32 to vector<8x128xf32>
      %c0_17 = arith.constant 0 : index
      %c0_18 = arith.constant 0 : index
      %20 = vector.load %arg8[%c0_17, %c0_18] : memref<8x128xf32, #tpu.memory_space<vmem>>, vector<8x128xf32>
      tpu.vector_store %arg8[%c0_17, %c0_18], %19 {strides = array<i32>} : memref<8x128xf32, #tpu.memory_space<vmem>>, vector<8x128xf32>,
    } else {
    }
    %c0 = arith.constant 0 : index
    %c0_1 = arith.constant 0 : index
    %3 = vector.load %arg2[%c0, %c0_1] : memref<8x128xf32, #tpu.memory_space<vmem>>, vector<8x128xf32>
    %c0_2 = arith.constant 0 : index
    %c0_3 = arith.constant 0 : index
    %4 = vector.load %arg3[%c0_2, %c0_3] : memref<128x128xf32, #tpu.memory_space<vmem>>, vector<128x128xf32>
    %cst = arith.constant dense<0.000000e+00> : vector<8x128xf32>
    %5 = tpu.matmul %3, %4, %cst {dimension_numbers = #tpu.dot_dimension_numbers<[1], [0], [0], [1], [0, 0, 1, 1], [], []>} : vector<8x128xf32>, vector<128x128xf32>, vector<8x128xf32> -> vector<8x128xf32>
    %c0_4 = arith.constant 0 : index
    %c0_5 = arith.constant 0 : index
    %6 = vector.load %arg4[%c0_4, %c0_5] : memref<1x128xf32, #tpu.memory_space<vmem>>, vector<1x128xf32>
    %7 = vector.broadcast %6 : vector<1x128xf32> to vector<8x128xf32>
    %8 = arith.addf %5, %7 : vector<8x128xf32>
    %cst_6 = arith.constant 0.000000e+00 : f32
    %9 = vector.broadcast %cst_6 : f32 to vector<8x128xf32>
    %10 = arith.maximumf %8, %9 : vector<8x128xf32>
    %c0_7 = arith.constant 0 : index
    %c0_8 = arith.constant 0 : index
    %11 = vector.load %arg8[%c0_7, %c0_8] : memref<8x128xf32, #tpu.memory_space<vmem>>, vector<8x128xf32>
    %c0_9 = arith.constant 0 : index
    %c0_10 = arith.constant 0 : index
    %12 = vector.load %arg5[%c0_9, %c0_10] : memref<128x128xf32, #tpu.memory_space<vmem>>, vector<128x128xf32>
    %cst_11 = arith.constant dense<0.000000e+00> : vector<8x128xf32>
    %13 = tpu.matmul %10, %12, %cst_11 {dimension_numbers = #tpu.dot_dimension_numbers<[1], [0], [0], [1], [0, 0, 1, 1], [], []>} : vector<8x128xf32>, vector<128x128xf32>, vector<8x128xf32> -> vector<8x128xf32>
    %14 = arith.addf %11, %13 : vector<8x128xf32>
    %c0_12 = arith.constant 0 : index
    %c0_13 = arith.constant 0 : index
    %15 = vector.load %arg8[%c0_12, %c0_13] : memref<8x128xf32, #tpu.memory_space<vmem>>, vector<8x128xf32>
    tpu.vector_store %arg8[%c0_12, %c0_13], %14 {strides = array<i32>} : memref<8x128xf32, #tpu.memory_space<vmem>>, vector<8x128xf32>,
    %c0_i32_14 = arith.constant 0 : i32
    %16 = arith.cmpi eq, %arg1, %c0_i32_14 : i32
    %17 = arith.extui %16 : i1 to i32
    %c0_i32_15 = arith.constant 0 : i32
    %18 = arith.cmpi ne, %17, %c0_i32_15 : i32
    scf.if %18 {
      %c0_16 = arith.constant 0 : index
      %c0_17 = arith.constant 0 : index
      %19 = vector.load %arg8[%c0_16, %c0_17] : memref<8x128xf32, #tpu.memory_space<vmem>>, vector<8x128xf32>
      %c0_18 = arith.constant 0 : index
      %c0_19 = arith.constant 0 : index
      %20 = vector.load %arg6[%c0_18, %c0_19] : memref<1x128xf32, #tpu.memory_space<vmem>>, vector<1x128xf32>
      %21 = vector.broadcast %20 : vector<1x128xf32> to vector<8x128xf32>
      %22 = arith.addf %19, %21 : vector<8x128xf32>
      %c0_20 = arith.constant 0 : index
      %c0_21 = arith.constant 0 : index
      %23 = vector.load %arg7[%c0_20, %c0_21] : memref<8x128xf32, #tpu.memory_space<vmem>>, vector<8x128xf32>
      tpu.vector_store %arg7[%c0_20, %c0_21], %22 {strides = array<i32>} : memref<8x128xf32, #tpu.memory_space<vmem>>, vector<8x128xf32>,
    } else {
    }
    return
  }
  func.func @transform_0(%arg0: i32, %arg1: i32) -> (i32, i32) {
    %c0_i32 = arith.constant 0 : i32
    %c0_i32_0 = arith.constant 0 : i32
    return %arg0, %c0_i32 : i32, i32
  }
  func.func @transform_1(%arg0: i32, %arg1: i32) -> (i32, i32) {
    %c0_i32 = arith.constant 0 : i32
    %c0_i32_0 = arith.constant 0 : i32
    return %c0_i32, %arg1 : i32, i32
  }
  func.func @transform_2(%arg0: i32, %arg1: i32) -> (i32, i32) {
    %c0_i32 = arith.constant 0 : i32
    %c0_i32_0 = arith.constant 0 : i32
    return %c0_i32, %arg1 : i32, i32
  }
  func.func @transform_3(%arg0: i32, %arg1: i32) -> (i32, i32) {
    %c0_i32 = arith.constant 0 : i32
    %c0_i32_0 = arith.constant 0 : i32
    return %arg1, %c0_i32 : i32, i32
  }
  func.func @transform_4(%arg0: i32, %arg1: i32) -> (i32, i32) {
    %c0_i32 = arith.constant 0 : i32
    %c0_i32_0 = arith.constant 0 : i32
    %c0_i32_1 = arith.constant 0 : i32
    return %c0_i32, %c0_i32_0 : i32, i32
  }
  func.func @transform_5(%arg0: i32, %arg1: i32) -> (i32, i32) {
    %c0_i32 = arith.constant 0 : i32
    %c0_i32_0 = arith.constant 0 : i32
    return %arg0, %c0_i32 : i32, i32
  }
}

</mosaic_0001>

<bundles_post_ra>
// kernel: _forward_padded.1
= control target key start
LH: loop header
LB: loop body
LE: loop exit
PB: predicated region body
PF: predicated region fallthrough
CT: control target
= control target key end

     0   :  { %10 = vsyncpa [#allocation4], 0  ;;  %s650_s0 = inlined_call_operand.hbm [shape: f32[8,128], index: 0, kind: input, shape index: {}]   ;;  %s651_s1 = inlined_call_operand.hbm [shape: f32[128,128], index: 1, kind: input, shape index: {}]   ;;  %s652_s2 = inlined_call_operand.vmem [shape: f32[1,128], index: 2, kind: input, shape index: {}]   ;;  %s653_s3 = inlined_call_operand.hbm [shape: f32[128,128], index: 3, kind: input, shape index: {}]   ;;  %s654_s4 = inlined_call_operand.vmem [shape: f32[1,128], index: 4, kind: input, shape index: {}]   ;;  %s655_s5 = inlined_call_operand.hbm [shape: f32[8,128], index: 5, kind: output, shape index: {}]  }
   0x1   :  { %11 = vsyncpa [#allocation7], 0 }
   0x2   :  { %12 = vsyncpa [#allocation5], 0  ;;  %s535_s18 = smov [#allocation6]   ;;  %s441_s22 = scalar_lea.hbm %s651_s1, 2048 }
   0x3   :  { %s28_s19 = sshll.u32 %s535_s18, 4  ;;  %p442_p0 = scmp.ne.s32.totalorder %s651_s1, %s441_s22  ;;  %s29_s19 = int_to_ptr.vmem [resolvable:$true] %s28_s19 }
   0x4   :  { %p445_p1 = scmp.lt.u32.totalorder %s441_s22, %s651_s1 }
   0x6   :  { %p447_p2 = pnand %p445_p1, %p442_p0 }
   0x8   :  { %450 = shalt.err (!%p447_p2)
}
   0x9   :  { %s451_s27 = scalar_lea.vmem %s29_s19, 2048  ;;  %p456_p4 = scmp.lt.s32.totalorder %s29_s19, %s29_s19 }
   0xa   :  { %p452_p3 = scmp.ne.s32.totalorder %s29_s19, %s451_s27  ;;  %p457_p5 = scmp.lt.s32.totalorder %s451_s27, %s451_s27 }
   0xc   :  { %p458_p6 = por %p457_p5, %p456_p4 }
   0xe   :  { %p459_p7 = pnand %p458_p6, %p452_p3 }
  0x10   :  { %462 = shalt.err (!%p459_p7)
}
  0x11   :  { %s536_s28 = smov 128   ;;  %s537_s29 = smov 8  }
  0x12   :  { %34 = dma.hbm_to_vmem [thread:$0]  %s651_s1, 2048, %s29_s19, [#allocation7], %s536_s28, %s536_s28, %s537_s29  }
  0x13   :  { %s538_s7 = smov [#allocation3]   ;;  %s539_s9 = smov [#allocation8]  }
  0x14   :  { %s19_s8 = sshll.u32 %s538_s7, 4  ;;  %s42_s10 = sshll.u32 %s539_s9, 4  ;;  %s20_s8 = int_to_ptr.vmem [resolvable:$true] %s19_s8  ;;  %s43_s10 = int_to_ptr.vmem [resolvable:$true] %s42_s10 }
  0x15   :  { %s463_s13 = scalar_lea.hbm %s650_s0, 128 }
  0x16   :  { %p464_p8 = scmp.ne.s32.totalorder %s650_s0, %s463_s13  ;;  %p467_p9 = scmp.lt.u32.totalorder %s463_s13, %s650_s0 }
  0x18   :  { %p469_p10 = pnand %p467_p9, %p464_p8 }
  0x1a   :  { %472 = shalt.err (!%p469_p10)
}
  0x1b   :  { %s473_s1 = scalar_lea.vmem %s20_s8, 128  ;;  %p478_p12 = scmp.lt.s32.totalorder %s20_s8, %s20_s8 }
  0x1c   :  { %p474_p11 = scmp.ne.s32.totalorder %s20_s8, %s473_s1  ;;  %p479_p13 = scmp.lt.s32.totalorder %s473_s1, %s473_s1 }
  0x1e   :  { %p480_p0 = por %p479_p13, %p478_p12 }
  0x20   :  { %p481_p1 = pnand %p480_p0, %p474_p11 }
  0x22   :  { %484 = shalt.err (!%p481_p1)
}
  0x23   :  { %22 = dma.hbm_to_vmem [thread:$0]  %s650_s0, 128, %s20_s8, [#allocation4]  }
  0x24   :  { %s485_s22 = scalar_lea.hbm %s653_s3, 2048 }
  0x25   :  { %p486_p2 = scmp.ne.s32.totalorder %s653_s3, %s485_s22  ;;  %p489_p3 = scmp.lt.u32.totalorder %s485_s22, %s653_s3 }
  0x27   :  { %p491_p4 = pnand %p489_p3, %p486_p2 }
  0x29   :  { %494 = shalt.err (!%p491_p4)
}
  0x2a   :  { %s495_s27 = scalar_lea.vmem %s43_s10, 2048  ;;  %p500_p6 = scmp.lt.s32.totalorder %s43_s10, %s43_s10 }
  0x2b   :  { %p496_p5 = scmp.ne.s32.totalorder %s43_s10, %s495_s27  ;;  %p501_p7 = scmp.lt.s32.totalorder %s495_s27, %s495_s27 }
  0x2d   :  { %p502_p8 = por %p501_p7, %p500_p6 }
  0x2f   :  { %p503_p9 = pnand %p502_p8, %p496_p5 }
  0x31   :  { %506 = shalt.err (!%p503_p9)
}
  0x32   :  { %48 = dma.hbm_to_vmem [thread:$0]  %s653_s3, 2048, %s43_s10, [#allocation7], %s536_s28, %s536_s28, %s537_s29  }
  0x33   :  { %529 = dma.done.wait [#allocation4], 128  }
  0x34   :  { %530 = vsyncadd [#allocation4], 4294967168 }
  0x35   :  { %531 = dma.done.wait [#allocation7], 4096  }
  0x36   :  { %532 = vsyncadd [#allocation7], 4294963200  ;;  %v540_v0 = vmov 0.0|0.0   ;;  %vm541_vm0 = vmmov 0   ;;  %v542_v1 = vmov 0.0   ;;  %v66_v2 = vld [vmem:[#allocation6] sm:$0xff] }
  0x37   :  { %384 = vmatprep.subr.bf16.mxu0 %v540_v0  ;;  %346 = vmatprep.mubr.msk.f32.mxu0 %vm541_vm0, %v542_v1  ;;  %v67_v3 = vld [vmem:[#allocation6 + $0x8] sm:$0xff]  ;;  %v68_v4 = vld [vmem:[#allocation6 + $0x10] sm:$0xff]  ;;  %v69_v6 = vld [vmem:[#allocation6 + $0x18] sm:$0xff]  ;;  %s543_s7 = smov [#allocation9]  }
  0x38   :  { %408 = vmatprep.subr.bf16.mxu1 %v540_v0  ;;  %381 = vmatprep.mubr.msk.f32.mxu1 %vm541_vm0, %v542_v1  ;;  %v385_v5 = vpack.c.bf16 %v67_v3, %v66_v2  ;;  %v388_v7 = vpack.c.bf16 %v69_v6, %v68_v4  ;;  %v70_v8 = vld [vmem:[#allocation6 + $0x20] sm:$0xff]  ;;  %v71_v9 = vld [vmem:[#allocation6 + $0x28] sm:$0xff]  ;;  %v163_v12 = vld [vmem:[#allocation8 + $0x10] sm:$0xff]  ;;  %s268_s8 = sshll.u32 %s543_s7, 4  ;;  %s269_s8 = int_to_ptr.vmem [resolvable:$true] %s268_s8 }
  0x39   :  { %v161_v10 = vld [vmem:[#allocation8] sm:$0xff]  ;;  %v162_v11 = vld [vmem:[#allocation8 + $0x8] sm:$0xff]  ;;  %v164_v13 = vld [vmem:[#allocation8 + $0x18] sm:$0xff]  ;;  %v391_v14 = vpack.c.bf16 %v71_v9, %v70_v8  ;;  %s507_s9 = scalar_lea.vmem %s269_s8, 128  ;;  %p512_p11 = scmp.lt.s32.totalorder %s269_s8, %s269_s8 }
  0x3a   :  { %386 = vmatpush3.bf16.msra.mxu0 %v385_v5  ;;  %v409_v15 = vpack.c.bf16 %v162_v11, %v161_v10  ;;  %v72_v16 = vld [vmem:[#allocation6 + $0x30] sm:$0xff]  ;;  %v73_v17 = vld [vmem:[#allocation6 + $0x38] sm:$0xff]  ;;  %v412_v18 = vpack.c.bf16 %v164_v13, %v163_v12  ;;  %v165_v19 = vld [vmem:[#allocation8 + $0x20] sm:$0xff]  ;;  %p508_p10 = scmp.ne.s32.totalorder %s269_s8, %s507_s9  ;;  %p513_p12 = scmp.lt.s32.totalorder %s507_s9, %s507_s9 }
  0x3b   :  { %387 = vmatprep.subr.bf16.mxu0 %v540_v0  ;;  %v166_v20 = vld [vmem:[#allocation8 + $0x28] sm:$0xff]  ;;  %v394_v21 = vpack.c.bf16 %v73_v17, %v72_v16  ;;  %v74_v22 = vld [vmem:[#allocation6 + $0x40] sm:$0xff]  ;;  %v167_v25 = vld [vmem:[#allocation8 + $0x30] sm:$0xff] }
  0x3c   :  { %410 = vmatpush3.bf16.msra.mxu1 %v409_v15  ;;  %v75_v23 = vld [vmem:[#allocation6 + $0x48] sm:$0xff]  ;;  %v415_v24 = vpack.c.bf16 %v166_v20, %v165_v19  ;;  %v168_v26 = vld [vmem:[#allocation8 + $0x38] sm:$0xff]  ;;  %v76_v28 = vld [vmem:[#allocation6 + $0x50] sm:$0xff]  ;;  %p514_p13 = por %p513_p12, %p512_p11 }
  0x3d   :  { %411 = vmatprep.subr.bf16.mxu1 %v540_v0  ;;  %v397_v27 = vpack.c.bf16 %v75_v23, %v74_v22  ;;  %v77_v29 = vld [vmem:[#allocation6 + $0x58] sm:$0xff]  ;;  %v418_v30 = vpack.c.bf16 %v168_v26, %v167_v25  ;;  %v169_v31 = vld [vmem:[#allocation8 + $0x40] sm:$0xff]  ;;  %v170_v32 = vld [vmem:[#allocation8 + $0x48] sm:$0xff] }
  0x3e   :  { %389 = vmatpush3.bf16.msra.mxu0 %v388_v7  ;;  %v400_v33 = vpack.c.bf16 %v77_v29, %v76_v28  ;;  %v78_v34 = vld [vmem:[#allocation6 + $0x60] sm:$0xff]  ;;  %v79_v35 = vld [vmem:[#allocation6 + $0x68] sm:$0xff]  ;;  %v421_v36 = vpack.c.bf16 %v170_v32, %v169_v31  ;;  %v171_v37 = vld [vmem:[#allocation8 + $0x50] sm:$0xff]  ;;  %p515_p0 = pnand %p514_p13, %p508_p10 }
  0x3f   :  { %390 = vmatprep.subr.bf16.mxu0 %v540_v0  ;;  %v172_v38 = vld [vmem:[#allocation8 + $0x58] sm:$0xff]  ;;  %v403_v39 = vpack.c.bf16 %v79_v35, %v78_v34  ;;  %v80_v40 = vld [vmem:[#allocation6 + $0x70] sm:$0xff]  ;;  %v173_v43 = vld [vmem:[#allocation8 + $0x60] sm:$0xff] }
  0x40   :  { %413 = vmatpush3.bf16.msra.mxu1 %v412_v18  ;;  %v81_v41 = vld [vmem:[#allocation6 + $0x78] sm:$0xff]  ;;  %v424_v42 = vpack.c.bf16 %v172_v38, %v171_v37  ;;  %v174_v44 = vld [vmem:[#allocation8 + $0x68] sm:$0xff]  ;;  %v175_v48 = vld [vmem:[#allocation8 + $0x70] sm:$0xff] }
  0x41   :  { %414 = vmatprep.subr.bf16.mxu1 %v540_v0  ;;  %v406_v45 = vpack.c.bf16 %v81_v41, %v80_v40  ;;  %v427_v46 = vpack.c.bf16 %v174_v44, %v173_v43  ;;  %v65_v47 = vld [vmem:[#allocation3] sm:$0xff] }
  0x42   :  { %392 = vmatpush3.bf16.msra.mxu0 %v391_v14  ;;  %v176_v49 = vld [vmem:[#allocation8 + $0x78] sm:$0xff] }
  0x43   :  { %393 = vmatprep.subr.bf16.mxu0 %v540_v0  ;;  %v430_v50 = vpack.c.bf16 %v176_v49, %v175_v48  ;;  %v278_v51 = vld [vmem:[%s652_s2] ss:$0 sm:$0xff] }
  0x44   :  { %416 = vmatpush3.bf16.msra.mxu1 %v415_v24  ;;  %v279_v56 = vld [vmem:[%s654_s4] ss:$0 sm:$0xff] }
  0x45   :  { %417 = vmatprep.subr.bf16.mxu1 %v540_v0 }
  0x46   :  { %395 = vmatpush3.bf16.msra.mxu0 %v394_v21 }
  0x47   :  { %396 = vmatprep.subr.bf16.mxu0 %v540_v0 }
  0x48   :  { %419 = vmatpush3.bf16.msra.mxu1 %v418_v30 }
  0x49   :  { %420 = vmatprep.subr.bf16.mxu1 %v540_v0 }
  0x4a   :  { %398 = vmatpush3.bf16.msra.mxu0 %v397_v27 }
  0x4b   :  { %399 = vmatprep.subr.bf16.mxu0 %v540_v0 }
  0x4c   :  { %422 = vmatpush3.bf16.msra.mxu1 %v421_v36 }
  0x4d   :  { %423 = vmatprep.subr.bf16.mxu1 %v540_v0 }
  0x4e   :  { %401 = vmatpush3.bf16.msra.mxu0 %v400_v33 }
  0x4f   :  { %402 = vmatprep.subr.bf16.mxu0 %v540_v0 }
  0x50   :  { %425 = vmatpush3.bf16.msra.mxu1 %v424_v42 }
  0x51   :  { %426 = vmatprep.subr.bf16.mxu1 %v540_v0 }
  0x52   :  { %404 = vmatpush3.bf16.msra.mxu0 %v403_v39 }
  0x53   :  { %405 = vmatprep.subr.bf16.mxu0 %v540_v0 }
  0x54   :  { %428 = vmatpush3.bf16.msra.mxu1 %v427_v46 }
  0x55   :  { %429 = vmatprep.subr.bf16.mxu1 %v540_v0 }
  0x56   :  { %407 = vmatpush3.bf16.msra.mxu0 %v406_v45 }
  0x58   :  { %431 = vmatpush3.bf16.msra.mxu1 %v430_v50 }
  0x59   :  { %347 = vmatmul.mubr.f32.vlgmr.msra.gmra.mrb[0].mxu0 %v65_v47 }
 0x12c   :  { %v155_v52 = vpop.f32.mrb[0].mxu0 }
 0x12d   :  { %v156_v53 = vadd.f32 %v278_v51, %v155_v52  ;;  %v348_v54 = vpop.f32.mrb[1].mxu0 }
 0x12f   :  { %v159_v55 = vmax.f32 %v156_v53, 0.0 }
 0x131   :  { %382 = vmatmul.mubr.f32.vlgmr.msra.gmra.mrb[0].mxu1 %v159_v55 }
 0x204   :  { %v243_v57 = vpop.f32.mrb[0].mxu1 }
 0x205   :  { %v260_v58 = vadd.f32 %v279_v56, %v243_v57  ;;  %v383_v59 = vpop.f32.mrb[1].mxu1 }
 0x207   :  { %261 = vst [vmem:[#allocation9] sm:$0xff] %v260_v58 }
 0x208   :  { %518 = shalt.err (!%p515_p0)
}
 0x209   :  { %s519_s11 = scalar_lea.hbm %s655_s5, 128 }
 0x20a   :  { %p520_p1 = scmp.ne.s32.totalorder %s655_s5, %s519_s11  ;;  %p523_p2 = scmp.lt.u32.totalorder %s519_s11, %s655_s5 }
 0x20c   :  { %p525_p3 = pnand %p523_p2, %p520_p1 }
 0x20e   :  { %528 = shalt.err (!%p525_p3)
}
 0x20f   :  { %271 = dma.vmem_to_hbm [thread:$0]  %s269_s8, 128, %s655_s5, [#allocation5]  }
 0x210   :  { %533 = dma.done.wait [#allocation5], 128  }
 0x211   :  { %534 = vsyncadd [#allocation5], 4294967168 }
 0x212   :  { %275 = vsyncpa [#allocation4], 1 }
 0x213   :  { %276 = vsyncpa [#allocation7], 1 }
 0x214   :  { %277 = vsyncpa [#allocation5], 1 }

</bundles_post_ra>
